<compile_context>
chip_gen: v6e
topology: v6e:2x2x1
jax: 0.10.0
libtpu: 0.0.40
codegen_flags: <defaults>
</compile_context>

<pallas_src>
import functools
import math

import jax
import jax.numpy as jnp
from jax.experimental import pallas as pl
from jax.experimental.pallas import tpu as pltpu


def _seesaw_loss_kernel(logits_ref, tgt_logit_ref, log_acc_t_ref, log_acc_ref,
                        loss_ref, loss_acc, *, p, q, log_eps, batch, tile_b,
                        tiles_per_split):
    c = pl.program_id(0)                      # parallel batch split
    t = pl.program_id(1)                      # batch tile within split
    nt = pl.num_programs(1)

    @pl.when(t == 0)
    def _init():
        loss_acc[...] = jnp.zeros_like(loss_acc)

    logits = logits_ref[...].astype(jnp.float32)            # (TB, C) f32
    tgt_logit = tgt_logit_ref[...]                           # (TB, 1) f32

    # Validity mask for ragged / phantom batch tiles (uses the LOGICAL tile
    # index, so boundary-block garbage rows never contribute).
    row0 = (c * tiles_per_split + t) * tile_b
    row_ids = row0 + jax.lax.broadcasted_iota(jnp.int32, (tile_b, 1), 0)
    valid = row_ids < batch                                   # (TB, 1) bool

    # ---- seesaw reweighting, entirely in log space (fused) -----------------
    log_seesaw = None
    if p > 0:                                                 # mitigation factor
        log_ratio_m = log_acc_ref[...] - log_acc_t_ref[...]   # (TB, C)
        log_seesaw = jnp.where(log_ratio_m < 0.0, p * log_ratio_m, 0.0)
    if q > 0:                                                 # compensation factor
        m1 = jnp.max(logits, axis=1, keepdims=True)
        lse1 = m1 + jnp.log(jnp.sum(jnp.exp(logits - m1), axis=1, keepdims=True))
        log_self = jnp.maximum(tgt_logit - lse1, log_eps)     # log(max(p_t, eps))
        log_ratio_s = (logits - lse1) - log_self              # (TB, C)
        term_q = jnp.where(log_ratio_s > 0.0, q * log_ratio_s, 0.0)
        log_seesaw = term_q if log_seesaw is None else log_seesaw + term_q

    # Cross-entropy on the reweighted logits.  log_seesaw == 0 at the target
    # column, so no one-hot select is needed (bit-equivalent to the reference).
    new_logits = logits if log_seesaw is None else logits + log_seesaw
    m2 = jnp.max(new_logits, axis=1, keepdims=True)
    lse2 = m2 + jnp.log(jnp.sum(jnp.exp(new_logits - m2), axis=1, keepdims=True))
    per_sample = jnp.where(valid, lse2 - tgt_logit, 0.0)      # (TB, 1)
    loss_acc[...] += jnp.sum(per_sample, axis=0, keepdims=True)

    @pl.when(t == nt - 1)
    def _finalize():
        # lane-dense partial-sum slab for this split
        loss_ref[...] = jnp.broadcast_to(loss_acc[...].reshape(1, 1, 1),
                                         loss_ref.shape)


def seesaw_loss(outputs, targets, accumulated, *, p=0.8, q=2.0, eps=0.01,
                tile_b=None, num_parallel=1):
    """Functional SeesawLoss forward.

    Args:
      outputs:     (B, C) logits (f32 or bf16, streamed without casting).
      targets:     (B,)  int class indices.
      accumulated: (C,)  running class counts (the module buffer).
      num_parallel: 1 for v5e/v6e; 2 on v7x to split the batch across cores.
    Returns:
      (loss_scalar, new_accumulated)
    """
    B, C = outputs.shape
    targets = targets.astype(jnp.int32)

    # Whole-batch class counts (the buffer update) must exist BEFORE the
    # mitigation factor, so do the tiny scatter-add in the wrapper.
    counts = jnp.zeros((C,), jnp.float32).at[targets].add(1.0)
    acc_new = accumulated.astype(jnp.float32) + counts

    # Precompute per-class / per-sample quantities (removes all one-hot, iota
    # and masked row-reductions from the kernel).
    log_acc = jnp.log(jnp.maximum(acc_new, 1.0))                       # (C,)
    tgt_logit = jnp.take_along_axis(
        outputs, targets[:, None], axis=1).astype(jnp.float32)         # (B, 1)
    log_acc_t = log_acc[targets][:, None]                              # (B, 1)
    log_acc_row = log_acc.reshape(1, C)                                # (1, C)

    # Batch tiling: sublane multiple depends on dtype (f32->8, bf16->16, i8->32).
    itemsize = jnp.dtype(outputs.dtype).itemsize
    sub = max(8, 32 // itemsize)

    if tile_b is None:
        # ~12 MiB budget per step: double-buffered input tile + ~6 f32 temps.
        per_row = C * (2 * itemsize + 6 * 4) + 32
        tile_b = max(sub, min(1024, (12 << 20) // per_row))
    tile_b = max(sub, (int(tile_b) // sub) * sub)

    if B < sub:
        # Tiny pad (< one sublane group) so the single block is layout-legal.
        pad = sub - B
        logits_k = jnp.concatenate(
            [outputs, jnp.zeros((pad, C), outputs.dtype)], axis=0)
        tgt_logit_k = jnp.concatenate(
            [tgt_logit, jnp.zeros((pad, 1), jnp.float32)], axis=0)
        log_acc_t_k = jnp.concatenate(
            [log_acc_t, jnp.zeros((pad, 1), jnp.float32)], axis=0)
        rows = sub
        tile_b = sub
    else:
        # No wrapper padding: ragged tail handled by boundary blocks + mask.
        tile_b = min(tile_b, (B // sub) * sub)
        logits_k, tgt_logit_k, log_acc_t_k = outputs, tgt_logit, log_acc_t
        rows = B

    n_tiles = pl.cdiv(rows, tile_b)
    num_parallel = max(1, min(int(num_parallel), n_tiles))
    tiles_per_split = pl.cdiv(n_tiles, num_parallel)

    if num_parallel * tiles_per_split != n_tiles:
        # Clamp phantom tile indices of an imbalanced split (valid-mask zeroes
        # their contribution since it uses the logical row index).
        def row_map(c, t):
            return (jnp.minimum(c * tiles_per_split + t, n_tiles - 1), 0)
    else:
        def row_map(c, t):
            return (c * tiles_per_split + t, 0)

    kernel = functools.partial(
        _seesaw_loss_kernel, p=p, q=q, log_eps=math.log(eps), batch=B,
        tile_b=tile_b, tiles_per_split=tiles_per_split)

    # Scoped-VMEM sized from the footprint (lifts v5e's 16 MiB default, stays
    # well under v7x's 64 MiB per-core physical VMEM).
    vmem_need = (2 * tile_b * C * itemsize      # double-buffered logits tile
                 + 8 * tile_b * C * 4           # f32 temporaries (generous)
                 + 8 * tile_b * 4 + 8 * C * 4 + (1 << 20))
    vmem_limit = int(min(48 << 20, max(32 << 20, vmem_need)))

    partial_loss = pl.pallas_call(
        kernel,
        out_shape=jax.ShapeDtypeStruct((num_parallel, 8, 128), jnp.float32),
        grid_spec=pltpu.PrefetchScalarGridSpec(
            num_scalar_prefetch=0,
            grid=(num_parallel, tiles_per_split),
            in_specs=[
                pl.BlockSpec((tile_b, C), row_map),           # logits tile
                pl.BlockSpec((tile_b, 1), row_map),           # target logit
                pl.BlockSpec((tile_b, 1), row_map),           # log count[target]
                pl.BlockSpec((1, C), lambda c, t: (0, 0)),    # log counts (resident)
            ],
            out_specs=pl.BlockSpec((1, 8, 128), lambda c, t: (c, 0, 0)),
            scratch_shapes=[pltpu.VMEM((1, 1), jnp.float32)],
        ),
        compiler_params=pltpu.CompilerParams(
            dimension_semantics=("parallel", "arbitrary"),
            vmem_limit_bytes=vmem_limit),
    )(logits_k, tgt_logit_k, log_acc_t_k, log_acc_row)

    loss = jnp.sum(partial_loss[:, 0, 0]) / B
    return loss, acc_new


def _seesaw_loss_ref(outputs, targets, accumulated, *, p=0.8, q=2.0, eps=0.01):
    """Pure-JAX reference matching the PyTorch forward."""
    B, C = outputs.shape
    onehot = jax.nn.one_hot(targets, C, dtype=jnp.float32)
    acc_new = accumulated + jnp.sum(onehot, axis=0)
    seesaw = jnp.ones((B, C), jnp.float32)
    if p > 0:
        acc_c = jnp.maximum(acc_new, 1.0)
        matrix = acc_c[None, :] / acc_c[:, None]
        idx = (matrix < 1.0).astype(jnp.float32)
        sample_w = jnp.power(matrix, p) * idx + (1 - idx)
        seesaw = seesaw * sample_w[targets]
    if q > 0:
        scores = jax.nn.softmax(outputs, axis=1)
        self_scores = scores[jnp.arange(B), targets]
        sm = scores / jnp.maximum(self_scores, eps)[:, None]
        idx = (sm > 1.0).astype(jnp.float32)
        comp = jnp.power(sm, q) * idx + (1 - idx)
        seesaw = seesaw * comp
    new_logits = outputs + jnp.log(seesaw) * (1 - onehot)
    logp = jax.nn.log_softmax(new_logits, axis=1)
    loss = -jnp.mean(logp[jnp.arange(B), targets])
    return loss, acc_new


if __name__ == "__main__":
    key = jax.random.PRNGKey(0)
    k1, k2, k3, k4 = jax.random.split(key, 4)

    # Test 1: aligned small shapes (batch=8, num_classes=16), fresh buffer.
    B, C = 8, 16
    outputs = jax.random.normal(k1, (B, C), dtype=jnp.float32)
    targets = jax.random.randint(k2, (B,), 0, C, dtype=jnp.int32)
    accumulated = jnp.zeros((C,), dtype=jnp.float32)   # module buffer init

    loss, acc_new = seesaw_loss(outputs, targets, accumulated)
    jax.block_until_ready((loss, acc_new))
    loss_ref, acc_ref = _seesaw_loss_ref(outputs, targets, accumulated)
    assert jnp.allclose(loss, loss_ref, rtol=1e-4, atol=1e-4), (loss, loss_ref)
    assert jnp.allclose(acc_new, acc_ref), (acc_new, acc_ref)

    # Test 2: ragged batch + non-128 class count + warm buffer (mask path).
    B2, C2 = 13, 10
    outputs2 = jax.random.normal(k3, (B2, C2), dtype=jnp.float32)
    targets2 = jax.random.randint(k4, (B2,), 0, C2, dtype=jnp.int32)
    accumulated2 = jnp.arange(1, C2 + 1, dtype=jnp.float32) * 3.0

    loss2, acc_new2 = seesaw_loss(outputs2, targets2, accumulated2)
    jax.block_until_ready((loss2, acc_new2))
    loss2_ref, acc2_ref = _seesaw_loss_ref(outputs2, targets2, accumulated2)
    assert jnp.allclose(loss2, loss2_ref, rtol=1e-4, atol=1e-4), (loss2, loss2_ref)
    assert jnp.allclose(acc_new2, acc2_ref), (acc_new2, acc2_ref)

    print("KERNEL_OK")
</pallas_src>

<mosaic_0001>
module attributes {stable_mosaic.version = 11 : i64} {
  func.func @_seesaw_loss_kernel(%arg0: i32, %arg1: i32, %arg2: memref<8x16xf32, #tpu.memory_space<vmem>>, %arg3: memref<8x1xf32, #tpu.memory_space<vmem>>, %arg4: memref<8x1xf32, #tpu.memory_space<vmem>>, %arg5: memref<1x16xf32, #tpu.memory_space<vmem>>, %arg6: memref<1x8x128xf32, #tpu.memory_space<vmem>>, %arg7: memref<1x1xf32, #tpu.memory_space<vmem>>) attributes {dimension_semantics = [#tpu.dimension_semantics<parallel>, #tpu.dimension_semantics<arbitrary>], iteration_bounds = array<i64: 1, 1>, scalar_prefetch = 0 : i64, scratch_operands = 1 : i64, tpu.core_type = #tpu.core_type<tc>, window_params = [{transform_indices = @transform_0, window_bounds = array<i64: 8, 16>}, {transform_indices = @transform_1, window_bounds = array<i64: 8, 1>}, {transform_indices = @transform_2, window_bounds = array<i64: 8, 1>}, {pipeline_mode = #tpu.pipeline_mode<synchronous>, transform_indices = @transform_3, window_bounds = array<i64: 1, 16>}, {transform_indices = @transform_4, window_bounds = array<i64: 1, 8, 128>}]} {
    %c0_i32 = arith.constant 0 : i32
    %0 = arith.cmpi eq, %arg1, %c0_i32 : i32
    %1 = arith.extui %0 : i1 to i32
    %c0_i32_0 = arith.constant 0 : i32
    %2 = arith.cmpi ne, %1, %c0_i32_0 : i32
    scf.if %2 {
      %cst_27 = arith.constant 0.000000e+00 : f32
      %68 = vector.broadcast %cst_27 : f32 to vector<1x1xf32>
      %c0_28 = arith.constant 0 : index
      %c0_29 = arith.constant 0 : index
      %69 = vector.load %arg7[%c0_28, %c0_29] : memref<1x1xf32, #tpu.memory_space<vmem>>, vector<1x1xf32>
      tpu.vector_store %arg7[%c0_28, %c0_29], %68 {strides = array<i32>} : memref<1x1xf32, #tpu.memory_space<vmem>>, vector<1x1xf32>,
    } else {
    }
    %c0 = arith.constant 0 : index
    %c0_1 = arith.constant 0 : index
    %3 = vector.load %arg2[%c0, %c0_1] : memref<8x16xf32, #tpu.memory_space<vmem>>, vector<8x16xf32>
    %c0_2 = arith.constant 0 : index
    %c0_3 = arith.constant 0 : index
    %4 = vector.load %arg3[%c0_2, %c0_3] : memref<8x1xf32, #tpu.memory_space<vmem>>, vector<8x1xf32>
    %c1_i32 = arith.constant 1 : i32
    %5 = arith.muli %arg0, %c1_i32 : i32
    %6 = arith.addi %5, %arg1 : i32
    %c8_i32 = arith.constant 8 : i32
    %7 = arith.muli %6, %c8_i32 : i32
    %8 = tpu.iota {dimensions = array<i32: 0>} : vector<8x1xi32>
    %9 = vector.broadcast %7 : i32 to vector<8x1xi32>
    %10 = arith.addi %9, %8 : vector<8x1xi32>
    %c8_i32_4 = arith.constant 8 : i32
    %11 = vector.broadcast %c8_i32_4 : i32 to vector<8x1xi32>
    %12 = arith.cmpi slt, %10, %11 : vector<8x1xi32>
    %c0_5 = arith.constant 0 : index
    %c0_6 = arith.constant 0 : index
    %13 = vector.load %arg5[%c0_5, %c0_6] : memref<1x16xf32, #tpu.memory_space<vmem>>, vector<1x16xf32>
    %c0_7 = arith.constant 0 : index
    %c0_8 = arith.constant 0 : index
    %14 = vector.load %arg4[%c0_7, %c0_8] : memref<8x1xf32, #tpu.memory_space<vmem>>, vector<8x1xf32>
    %15 = vector.broadcast %13 : vector<1x16xf32> to vector<8x16xf32>
    %16 = vector.broadcast %14 : vector<8x1xf32> to vector<8x16xf32>
    %17 = arith.subf %15, %16 : vector<8x16xf32>
    %cst = arith.constant 0.000000e+00 : f32
    %18 = vector.broadcast %cst : f32 to vector<8x16xf32>
    %19 = arith.cmpf olt, %17, %18 : vector<8x16xf32>
    %cst_9 = arith.constant 8.000000e-01 : f32
    %20 = vector.broadcast %cst_9 : f32 to vector<8x16xf32>
    %21 = arith.mulf %20, %17 : vector<8x16xf32>
    %cst_10 = arith.constant 0.000000e+00 : f32
    %22 = vector.broadcast %cst_10 : f32 to vector<8x16xf32>
    %23 = arith.select %19, %21, %22 : vector<8x16xi1>, vector<8x16xf32>
    %cst_11 = arith.constant dense<0xFF800000> : vector<8xf32>
    %24 = vector.multi_reduction <maximumf>, %3, %cst_11 [1] : vector<8x16xf32> to vector<8xf32>
    %25 = vector.shape_cast %24 : vector<8xf32> to vector<8x1xf32>
    %26 = vector.broadcast %25 : vector<8x1xf32> to vector<8x16xf32>
    %27 = arith.subf %3, %26 : vector<8x16xf32>
    %28 = math.exp %27 : vector<8x16xf32>
    %cst_12 = arith.constant dense<0.000000e+00> : vector<8xf32>
    %29 = vector.multi_reduction <add>, %28, %cst_12 [1] : vector<8x16xf32> to vector<8xf32>
    %30 = vector.shape_cast %29 : vector<8xf32> to vector<8x1xf32>
    %31 = math.log %30 : vector<8x1xf32>
    %32 = arith.addf %25, %31 : vector<8x1xf32>
    %33 = arith.subf %4, %32 : vector<8x1xf32>
    %cst_13 = arith.constant -4.60517025 : f32
    %34 = vector.broadcast %cst_13 : f32 to vector<8x1xf32>
    %35 = arith.maximumf %33, %34 : vector<8x1xf32>
    %36 = vector.broadcast %32 : vector<8x1xf32> to vector<8x16xf32>
    %37 = arith.subf %3, %36 : vector<8x16xf32>
    %38 = vector.broadcast %35 : vector<8x1xf32> to vector<8x16xf32>
    %39 = arith.subf %37, %38 : vector<8x16xf32>
    %cst_14 = arith.constant 0.000000e+00 : f32
    %40 = vector.broadcast %cst_14 : f32 to vector<8x16xf32>
    %41 = arith.cmpf ogt, %39, %40 : vector<8x16xf32>
    %cst_15 = arith.constant 2.000000e+00 : f32
    %42 = vector.broadcast %cst_15 : f32 to vector<8x16xf32>
    %43 = arith.mulf %42, %39 : vector<8x16xf32>
    %cst_16 = arith.constant 0.000000e+00 : f32
    %44 = vector.broadcast %cst_16 : f32 to vector<8x16xf32>
    %45 = arith.select %41, %43, %44 : vector<8x16xi1>, vector<8x16xf32>
    %46 = arith.addf %23, %45 : vector<8x16xf32>
    %47 = arith.addf %3, %46 : vector<8x16xf32>
    %cst_17 = arith.constant dense<0xFF800000> : vector<8xf32>
    %48 = vector.multi_reduction <maximumf>, %47, %cst_17 [1] : vector<8x16xf32> to vector<8xf32>
    %49 = vector.shape_cast %48 : vector<8xf32> to vector<8x1xf32>
    %50 = vector.broadcast %49 : vector<8x1xf32> to vector<8x16xf32>
    %51 = arith.subf %47, %50 : vector<8x16xf32>
    %52 = math.exp %51 : vector<8x16xf32>
    %cst_18 = arith.constant dense<0.000000e+00> : vector<8xf32>
    %53 = vector.multi_reduction <add>, %52, %cst_18 [1] : vector<8x16xf32> to vector<8xf32>
    %54 = vector.shape_cast %53 : vector<8xf32> to vector<8x1xf32>
    %55 = math.log %54 : vector<8x1xf32>
    %56 = arith.addf %49, %55 : vector<8x1xf32>
    %57 = arith.subf %56, %4 : vector<8x1xf32>
    %cst_19 = arith.constant 0.000000e+00 : f32
    %58 = vector.broadcast %cst_19 : f32 to vector<8x1xf32>
    %59 = arith.select %12, %57, %58 : vector<8x1xi1>, vector<8x1xf32>
    %c0_20 = arith.constant 0 : index
    %c0_21 = arith.constant 0 : index
    %60 = vector.load %arg7[%c0_20, %c0_21] : memref<1x1xf32, #tpu.memory_space<vmem>>, vector<1x1xf32>
    %cst_22 = arith.constant dense<0.000000e+00> : vector<1xf32>
    %61 = vector.multi_reduction <add>, %59, %cst_22 [0] : vector<8x1xf32> to vector<1xf32>
    %62 = vector.shape_cast %61 : vector<1xf32> to vector<1x1xf32>
    %63 = arith.addf %60, %62 : vector<1x1xf32>
    %c0_23 = arith.constant 0 : index
    %c0_24 = arith.constant 0 : index
    %64 = vector.load %arg7[%c0_23, %c0_24] : memref<1x1xf32, #tpu.memory_space<vmem>>, vector<1x1xf32>
    tpu.vector_store %arg7[%c0_23, %c0_24], %63 {strides = array<i32>} : memref<1x1xf32, #tpu.memory_space<vmem>>, vector<1x1xf32>,
    %c0_i32_25 = arith.constant 0 : i32
    %65 = arith.cmpi eq, %arg1, %c0_i32_25 : i32
    %66 = arith.extui %65 : i1 to i32
    %c0_i32_26 = arith.constant 0 : i32
    %67 = arith.cmpi ne, %66, %c0_i32_26 : i32
    scf.if %67 {
      %c0_27 = arith.constant 0 : index
      %c0_28 = arith.constant 0 : index
      %68 = vector.load %arg7[%c0_27, %c0_28] : memref<1x1xf32, #tpu.memory_space<vmem>>, vector<1x1xf32>
      %69 = vector.shape_cast %68 : vector<1x1xf32> to vector<1x1x1xf32>
      %70 = vector.shape_cast %69 : vector<1x1x1xf32> to vector<1x1x1xf32>
      %71 = vector.broadcast %70 : vector<1x1x1xf32> to vector<1x8x128xf32>
      %c0_29 = arith.constant 0 : index
      %c0_30 = arith.constant 0 : index
      %c0_31 = arith.constant 0 : index
      %72 = vector.load %arg6[%c0_29, %c0_30, %c0_31] : memref<1x8x128xf32, #tpu.memory_space<vmem>>, vector<1x8x128xf32>
      tpu.vector_store %arg6[%c0_29, %c0_30, %c0_31], %71 {strides = array<i32>} : memref<1x8x128xf32, #tpu.memory_space<vmem>>, vector<1x8x128xf32>,
    } else {
    }
    return
  }
  func.func @transform_0(%arg0: i32, %arg1: i32) -> (i32, i32) {
    %c1_i32 = arith.constant 1 : i32
    %0 = arith.muli %arg0, %c1_i32 : i32
    %1 = arith.addi %0, %arg1 : i32
    %c0_i32 = arith.constant 0 : i32
    %c0_i32_0 = arith.constant 0 : i32
    return %1, %c0_i32 : i32, i32
  }
  func.func @transform_1(%arg0: i32, %arg1: i32) -> (i32, i32) {
    %c1_i32 = arith.constant 1 : i32
    %0 = arith.muli %arg0, %c1_i32 : i32
    %1 = arith.addi %0, %arg1 : i32
    %c0_i32 = arith.constant 0 : i32
    %c0_i32_0 = arith.constant 0 : i32
    return %1, %c0_i32 : i32, i32
  }
  func.func @transform_2(%arg0: i32, %arg1: i32) -> (i32, i32) {
    %c1_i32 = arith.constant 1 : i32
    %0 = arith.muli %arg0, %c1_i32 : i32
    %1 = arith.addi %0, %arg1 : i32
    %c0_i32 = arith.constant 0 : i32
    %c0_i32_0 = arith.constant 0 : i32
    return %1, %c0_i32 : i32, i32
  }
  func.func @transform_3(%arg0: i32, %arg1: i32) -> (i32, i32) {
    %c0_i32 = arith.constant 0 : i32
    %c0_i32_0 = arith.constant 0 : i32
    %c0_i32_1 = arith.constant 0 : i32
    return %c0_i32, %c0_i32_0 : i32, i32
  }
  func.func @transform_4(%arg0: i32, %arg1: i32) -> (i32, i32, i32) {
    %c0_i32 = arith.constant 0 : i32
    %c0_i32_0 = arith.constant 0 : i32
    %c0_i32_1 = arith.constant 0 : i32
    return %arg0, %c0_i32, %c0_i32_0 : i32, i32, i32
  }
}

</mosaic_0001>

<bundles_post_ra>
// kernel: tpu_custom_call.1
= control target key start
LH: loop header
LB: loop body
LE: loop exit
PB: predicated region body
PF: predicated region fallthrough
CT: control target
= control target key end

     0   :  { %vm101_vm0 = vcmask 130048   ;;  %s286_s0 = inlined_call_operand.vmem [shape: f32[8,16], index: 0, kind: input, shape index: {}]   ;;  %s287_s1 = inlined_call_operand.vmem [shape: f32[8,1], index: 1, kind: input, shape index: {}]   ;;  %s288_s2 = inlined_call_operand.vmem [shape: f32[8,1], index: 2, kind: input, shape index: {}]   ;;  %s289_s3 = inlined_call_operand.vmem [shape: f32[1,16], index: 3, kind: input, shape index: {}]   ;;  %s290_s4 = inlined_call_operand.hbm [shape: f32[1,8,128], index: 4, kind: output, shape index: {}]  }
   0x1   :  { %v75_v0 = vld [vmem:[%s286_s0] sm:$0xff] }
   0x2   :  { %9 = vsyncpa [#allocation4], 0  ;;  %v102_v1 = vsel %vm101_vm0, %v75_v0, -inf  ;;  %v237_v7 = vmov 0   ;;  %v85_v8 = vld [vmem:[%s288_s2] sm:$0xff]  ;;  %vm73_vm3 = vcmask 0  }
   0x3   :  { %103 = vmax.xlane.f32.xlu0 %v102_v1  ;;  %205 = vset.pattern.permute.xlu1 %v237_v7  ;;  %v76_v12 = vld [vmem:[%s287_s1] sm:$0xff]  ;;  %v238_v34 = vmov 0.0   ;;  %vm143_vm4 = vcmask 7168   ;;  %s239_s1 = smov [#allocation3]  }
   0x4   :  { %206 = vset.pattern.permute.xlu0 %v237_v7  ;;  %94 = vperm.xlu1 %205, %v85_v8   ;;  %v200_v17 = vld [vmem:[%s289_s3] ss:$0 sm:$0xff]  ;;  %74 = vst.msk [vmem:[#allocation2] sm:$0x1] %vm73_vm3, %v238_v34  ;;  %s174_s2 = sshll.u32 %s239_s1, 4  ;;  %s175_s2 = int_to_ptr.vmem [resolvable:$true] %s174_s2 }
   0x5   :  { %s215_s3 = scalar_lea.vmem %s175_s2, 128  ;;  %p220_p1 = scmp.lt.s32.totalorder %s175_s2, %s175_s2 }
   0x6   :  { %p216_p0 = scmp.ne.s32.totalorder %s175_s2, %s215_s3  ;;  %p221_p2 = scmp.lt.s32.totalorder %s215_s3, %s215_s3 }
   0x8   :  { %p222_p3 = por %p221_p2, %p220_p1 }
   0xa   :  { %p223_p4 = pnand %p222_p3, %p216_p0 }
   0xb   :  { %v142_v46 = vld [vmem:[#allocation2] sm:$0x1] }
  0x7f   :  { %v95_v16 = vpop.permute.xlu1 %94 }
  0x80   :  { %v97_v18 = vsub.f32 %v200_v17, %v95_v16 }
  0x82   :  { %v99_v21 = vmul.f32 0.8, %v97_v18  ;;  %vm98_vm1 = vcmp.lt.f32.partialorder %v97_v18, 0.0 }
  0x84   :  { %v100_v24 = vsel %vm98_vm1, %v99_v21, 0.0 }
  0x8c   :  { %v104_v2 = vpop.xlane.xlu0 %103 }
  0x8d   :  { %v105_v3 = vsub.f32 %v75_v0, %v104_v2 }
  0x8f   :  { %v106_v4 = vmul.f32 1.442695, %v105_v3 }
  0x91   :  { %207 = vpow2.f32 %v106_v4 }
  0x9e   :  { %v208_v5 = vpop.eup %207 }
  0x9f   :  { %v108_v6 = vsel %vm101_vm0, %v208_v5, 0.0 }
  0xa0   :  { %109 = vadd.xlane.f32.xlu0 %v108_v6 }
 0x129   :  { %v110_v9 = vpop.xlane.xlu0 %109 }
 0x12a   :  { %209 = vlog2.f32 %v110_v9 }
 0x137   :  { %v210_v10 = vpop.eup %209 }
 0x138   :  { %v112_v11 = vmul.f32 0.6931472, %v210_v10 }
 0x13a   :  { %v113_v13 = vadd.f32 %v112_v11, %v104_v2 }
 0x13c   :  { %v114_v14 = vsub.f32 %v76_v12, %v113_v13  ;;  %v116_v19 = vsub.f32 %v75_v0, %v113_v13 }
 0x13e   :  { %v115_v15 = vmax.f32 %v114_v14, -4.6051702 }
 0x140   :  { %119 = vperm.xlu1 %205, %v115_v15  }
 0x1bb   :  { %v120_v20 = vpop.permute.xlu1 %119 }
 0x1bc   :  { %v122_v22 = vsub.f32 %v116_v19, %v120_v20 }
 0x1be   :  { %vm123_vm2 = vcmp.gt.f32.partialorder %v122_v22, 0.0  ;;  %v124_v23 = vmul.f32 2.0, %v122_v22 }
 0x1c0   :  { %v125_v25 = vsel %vm123_vm2, %v124_v23, 0.0 }
 0x1c1   :  { %v126_v26 = vadd.f32 %v125_v25, %v100_v24 }
 0x1c3   :  { %v127_v27 = vadd.f32 %v126_v26, %v75_v0 }
 0x1c5   :  { %v128_v28 = vsel %vm101_vm0, %v127_v27, -inf }
 0x1c6   :  { %129 = vmax.xlane.f32.xlu0 %v128_v28 }
 0x24f   :  { %v130_v29 = vpop.xlane.xlu0 %129 }
 0x250   :  { %v131_v30 = vsub.f32 %v127_v27, %v130_v29 }
 0x252   :  { %v132_v31 = vmul.f32 1.442695, %v131_v30 }
 0x254   :  { %211 = vpow2.f32 %v132_v31 }
 0x261   :  { %v212_v32 = vpop.eup %211 }
 0x262   :  { %v134_v33 = vsel %vm101_vm0, %v212_v32, 0.0 }
 0x263   :  { %135 = vadd.xlane.f32.xlu1 %v134_v33 }
 0x2ec   :  { %v136_v35 = vpop.xlane.xlu1 %135 }
 0x2ed   :  { %213 = vlog2.f32 %v136_v35 }
 0x2fa   :  { %v214_v36 = vpop.eup %213 }
 0x2fb   :  { %v138_v37 = vmul.f32 0.6931472, %v214_v36 }
 0x2fd   :  { %v139_v38 = vadd.f32 %v138_v37, %v130_v29 }
 0x2ff   :  { %v140_v39 = vsub.f32 %v139_v38, %v76_v12 }
 0x301   :  { %v144_v40 = vsel %vm143_vm4, %v140_v39, 0.0 }
 0x302   :  { %v145_v41 = vrot.slane %v144_v40, 4 }
 0x304   :  { %v146_v42 = vadd.f32 %v145_v41, %v144_v40 }
 0x306   :  { %v147_v43 = vrot.slane %v146_v42, 2 }
 0x308   :  { %v148_v44 = vadd.f32 %v147_v43, %v146_v42 }
 0x30a   :  { %v149_v45 = vrot.slane %v148_v44, 1 }
 0x30c   :  { %v150_v47 = vadd.f32 %v149_v45, %v148_v44 }
 0x30e   :  { %v151_v48 = vadd.f32 %v150_v47, %v142_v46 }
 0x310   :  { %153 = vst.msk [vmem:[#allocation2] sm:$0x1] %vm73_vm3, %v151_v48 }
 0x317   :  { %v201_v49 = vld [vmem:[#allocation2] ss:$0 sm:$0xff] }
 0x318   :  { %164 = vperm.xlu0 %206, %v201_v49  }
 0x393   :  { %v165_v50 = vpop.permute.xlu0 %164 }
 0x394   :  { %167 = vst [vmem:[#allocation3] sm:$0xff] %v165_v50 }
 0x395   :  { %226 = shalt.err (!%p223_p4)
}
 0x396   :  { %177 = dma.vmem_to_hbm [thread:$0]  %s175_s2, 128, %s290_s4, [#allocation4]  }
 0x397   :  { %235 = dma.done.wait [#allocation4], 128  }
 0x398   :  { %236 = vsyncadd [#allocation4], 4294967168 }
 0x399   :  { %181 = vsyncpa [#allocation4], 1 }

</bundles_post_ra>
